<compile_context>
chip_gen: v7x
topology: tpu7x:2x2x1
jax: 0.10.0
libtpu: 0.0.40
codegen_flags: <defaults>
</compile_context>

<pallas_src>
import random
from typing import Tuple, Union

import jax
import jax.numpy as jnp
from jax.experimental import pallas as pl
from jax.experimental.pallas import tpu as pltpu


def get_random_rectangle_inside(
    image_size: Tuple[int, int],
    height_ratio: Union[float, Tuple[float, float]],
    width_ratio: Union[float, Tuple[float, float]],
) -> Tuple[int, int, int, int]:
    """Host-side random rectangle, faithful to the reference implementation."""
    h, w = image_size
    if isinstance(height_ratio, (tuple, list)) and len(height_ratio) == 2:
        height_ratio = random.random() * (height_ratio[1] - height_ratio[0]) + height_ratio[0]
    if isinstance(width_ratio, (tuple, list)) and len(width_ratio) == 2:
        width_ratio = random.random() * (width_ratio[1] - width_ratio[0]) + width_ratio[0]
    h_start = random.randint(0, h - int(h * height_ratio))
    w_start = random.randint(0, w - int(w * width_ratio))
    h_end = h_start + int(h * height_ratio)
    w_end = w_start + int(w * width_ratio)
    return (h_start, h_end, w_start, w_end)


def _pseudo_crop_kernel(mask_ref, img_ref, out_ref):
    # mask_ref: (1, hw_tile) int8 keep-mask, grid-invariant along the row
    #           axis (hoisted out of the per-step body).
    # img_ref / out_ref: (row_tile, hw_tile) lane-dense tiles.
    keep = mask_ref[...] != 0
    zero = jnp.zeros((), dtype=img_ref.dtype)
    out_ref[...] = jnp.where(keep, img_ref[...], zero)


def _vmem_budget() -> Tuple[int, int]:
    """(target_block_bytes, vmem_limit_bytes), selected per TPU generation."""
    try:
        cap = pltpu.get_tpu_info().vmem_capacity_bytes
    except Exception:  # unknown hardware / interpret mode -> be conservative
        cap = None
    if cap is not None and cap >= 96 * 1024 * 1024:
        # v5e / v6e: 128 MiB VMEM, lower HBM BW -> larger blocks, fewer steps.
        return 8 * 1024 * 1024, 96 * 1024 * 1024
    # v7x: 64 MiB VMEM per TensorCore (2 TCs) -> stay at ~4 MiB blocks.
    return 4 * 1024 * 1024, 40 * 1024 * 1024


def pseudo_crop_apply(img: jax.Array,
                      bounds: Tuple[int, int, int, int]) -> jax.Array:
    """Zero everything outside bounds=(h_start, h_end, w_start, w_end)."""
    N, C, H, W = img.shape
    h_start, h_end, w_start, w_end = bounds
    R, HW = N * C, H * W
    x2d = img.reshape(R, HW)  # lane-dense view; free metadata reshape for NCHW

    # Grid-invariant keep-mask, built once from the static host-side bounds
    # (hoisted out of the kernel).  int8 keeps its HBM traffic negligible.
    rows = jnp.arange(H, dtype=jnp.int32)[:, None]
    cols = jnp.arange(W, dtype=jnp.int32)[None, :]
    inside = ((rows >= h_start) & (rows < h_end) &
              (cols >= w_start) & (cols < w_end))
    mask2d = inside.astype(jnp.int8).reshape(1, HW)

    itemsize = jnp.dtype(img.dtype).itemsize
    sub = max(8, 32 // itemsize)            # 8 f32, 16 bf16/f16, 32 int8/uint8
    target_block_bytes, vmem_limit = _vmem_budget()
    bytes_per_row = HW * itemsize

    if sub * bytes_per_row <= target_block_bytes:
        # Full spatial plane fits the budget: lane dim = HW, tile rows only.
        hw_tile = HW
        rows_fit = target_block_bytes // bytes_per_row
        row_tile = R if rows_fit >= R else max(sub, (rows_fit // sub) * sub)
    else:
        # Large spatial plane: minimum row tile, and tile the lane axis too so
        # block bytes stay clamped to the target (never sub * HW * itemsize).
        row_tile = R if R < sub else sub
        if HW % 128 == 0:
            cols_fit = target_block_bytes // (row_tile * itemsize)
            hw_tile = min(HW, max(128, (cols_fit // 128) * 128))
        else:
            hw_tile = HW   # (8,128) rule: non-multiple lane dim must be full

    grid = (pl.cdiv(R, row_tile), pl.cdiv(HW, hw_tile))

    out2d = pl.pallas_call(
        _pseudo_crop_kernel,
        out_shape=jax.ShapeDtypeStruct((R, HW), img.dtype),
        grid=grid,
        in_specs=[
            pl.BlockSpec((1, hw_tile), lambda i, j: (0, j)),         # mask
            pl.BlockSpec((row_tile, hw_tile), lambda i, j: (i, j)),  # image
        ],
        out_specs=pl.BlockSpec((row_tile, hw_tile), lambda i, j: (i, j)),
        input_output_aliases={1: 0},   # donate the image buffer (in-place)
        compiler_params=pltpu.CompilerParams(
            dimension_semantics=("parallel", "parallel"),
            vmem_limit_bytes=vmem_limit,
        ),
    )(mask2d, x2d)
    return out2d.reshape(N, C, H, W)


def random_pseudo_crop(img: jax.Array,
                       height_ratio: Union[float, Tuple[float, float]],
                       width_ratio: Union[float, Tuple[float, float]]) -> jax.Array:
    """img: (N, C, H, W). Returns img with everything outside a random
    rectangle zeroed out (same shape/dtype). Matches RandomPseudoCrop.forward."""
    _, _, H, W = img.shape
    bounds = get_random_rectangle_inside((H, W), height_ratio, width_ratio)
    return pseudo_crop_apply(img, bounds)


if __name__ == "__main__":
    # Deterministic host-side RNG for the crop rectangle.
    random.seed(0)

    # Deterministic example input: (N, C, H, W) = (2, 4, 16, 16)
    key = jax.random.PRNGKey(0)
    img = jax.random.normal(key, (2, 4, 16, 16), dtype=jnp.float32)

    # Sample the rectangle once so kernel and reference use identical bounds.
    h_start, h_end, w_start, w_end = get_random_rectangle_inside(
        (16, 16), (0.5, 0.8), (0.5, 0.8))

    out = jax.block_until_ready(
        pseudo_crop_apply(img, (h_start, h_end, w_start, w_end)))

    # Pure-JAX reference with the same bounds.
    ref_mask = jnp.zeros_like(img).at[:, :, h_start:h_end, w_start:w_end].set(1.0)
    ref = img * ref_mask

    assert out.shape == img.shape and out.dtype == img.dtype
    assert jnp.allclose(out, ref), "Pallas output mismatch vs reference"

    # Also exercise the random-sampling entry point (matches module forward).
    out2 = jax.block_until_ready(
        random_pseudo_crop(img, height_ratio=(0.5, 0.8), width_ratio=(0.5, 0.8)))
    assert out2.shape == img.shape and out2.dtype == img.dtype

    print("KERNEL_OK")
</pallas_src>

<mosaic_0001>
module attributes {stable_mosaic.version = 11 : i64} {
  func.func @_pseudo_crop_kernel(%arg0: i32, %arg1: i32, %arg2: memref<1x256xi8, #tpu.memory_space<vmem>>, %arg3: memref<8x256xf32, #tpu.memory_space<vmem>>, %arg4: memref<8x256xf32, #tpu.memory_space<vmem>>) attributes {dimension_semantics = [#tpu.dimension_semantics<parallel>, #tpu.dimension_semantics<parallel>], iteration_bounds = array<i64: 1, 1>, scalar_prefetch = 0 : i64, scratch_operands = 0 : i64, tpu.core_type = #tpu.core_type<tc>, window_params = [{transform_indices = @transform_0, window_bounds = array<i64: 1, 256>}, {transform_indices = @transform_1, window_bounds = array<i64: 8, 256>}, {transform_indices = @transform_2, window_bounds = array<i64: 8, 256>}]} {
    %c0 = arith.constant 0 : index
    %c0_0 = arith.constant 0 : index
    %0 = vector.load %arg2[%c0, %c0_0] : memref<1x256xi8, #tpu.memory_space<vmem>>, vector<1x256xi8>
    %c0_i8 = arith.constant 0 : i8
    %1 = vector.broadcast %c0_i8 : i8 to vector<1x256xi8>
    %2 = arith.cmpi ne, %0, %1 : vector<1x256xi8>
    %c0_1 = arith.constant 0 : index
    %c0_2 = arith.constant 0 : index
    %3 = vector.load %arg3[%c0_1, %c0_2] : memref<8x256xf32, #tpu.memory_space<vmem>>, vector<8x256xf32>
    %cst = arith.constant 0.000000e+00 : f32
    %4 = vector.shape_cast %2 : vector<1x256xi1> to vector<1x256xi1>
    %5 = vector.broadcast %4 : vector<1x256xi1> to vector<8x256xi1>
    %6 = vector.broadcast %cst : f32 to vector<8x256xf32>
    %7 = arith.select %5, %3, %6 : vector<8x256xi1>, vector<8x256xf32>
    %c0_3 = arith.constant 0 : index
    %c0_4 = arith.constant 0 : index
    %8 = vector.load %arg4[%c0_3, %c0_4] : memref<8x256xf32, #tpu.memory_space<vmem>>, vector<8x256xf32>
    tpu.vector_store %arg4[%c0_3, %c0_4], %7 {strides = array<i32>} : memref<8x256xf32, #tpu.memory_space<vmem>>, vector<8x256xf32>,
    return
  }
  func.func @transform_0(%arg0: i32, %arg1: i32) -> (i32, i32) {
    %c0_i32 = arith.constant 0 : i32
    %c0_i32_0 = arith.constant 0 : i32
    return %c0_i32, %arg1 : i32, i32
  }
  func.func @transform_1(%arg0: i32, %arg1: i32) -> (i32, i32) {
    %c0_i32 = arith.constant 0 : i32
    return %arg0, %arg1 : i32, i32
  }
  func.func @transform_2(%arg0: i32, %arg1: i32) -> (i32, i32) {
    %c0_i32 = arith.constant 0 : i32
    return %arg0, %arg1 : i32, i32
  }
}

</mosaic_0001>

<bundles_post_ra>
// kernel: tpu_custom_call.1
= control target key start
LH: loop header
LB: loop body
LE: loop exit
PB: predicated region body
PF: predicated region fallthrough
CT: control target
= control target key end

     0   :  { %7 = vsyncpa [#allocation3], 0  ;;  %s171_s0 = inlined_call_operand.vmem [shape: s8[1,256], index: 0, kind: input, shape index: {}]   ;;  %s172_s1 = inlined_call_operand.hbm [shape: f32[8,256], index: 1, kind: input, shape index: {}, may-alias: {1,2}]   ;;  %s173_s2 = inlined_call_operand.hbm [shape: f32[8,256], index: 2, kind: output, shape index: {}, may-alias: {1,2}]  }
   0x1   :  { %8 = vsyncpa [#allocation4], 0  ;;  %s126_s9 = smov [#allocation2]   ;;  %s78_s13 = scalar_lea.hbm %s172_s1, 256 }
   0x2   :  { %s17_s10 = sshll.u32 %s126_s9, 4  ;;  %p79_p0 = scmp.ne.s32.totalorder %s172_s1, %s78_s13  ;;  %s18_s10 = int_to_ptr.vmem [resolvable:$true] %s17_s10 }
   0x3   :  { %p82_p1 = scmp.lt.u32.totalorder %s78_s13, %s172_s1 }
   0x5   :  { %p84_p2 = pnand %p82_p1, %p79_p0 }
   0x7   :  { %87 = shalt.err (!%p84_p2)
}
   0x8   :  { %s88_s18 = scalar_lea.vmem %s18_s10, 256  ;;  %p93_p4 = scmp.lt.s32.totalorder %s18_s10, %s18_s10 }
   0x9   :  { %p89_p3 = scmp.ne.s32.totalorder %s18_s10, %s88_s18  ;;  %p94_p5 = scmp.lt.s32.totalorder %s88_s18, %s88_s18 }
   0xb   :  { %p95_p6 = por %p94_p5, %p93_p4 }
   0xd   :  { %p96_p7 = pnand %p95_p6, %p89_p3 }
   0xf   :  { %99 = shalt.err (!%p96_p7)
}
  0x10   :  { %20 = dma.hbm_to_vmem [thread:$0]  %s172_s1, 256, %s18_s10, [#allocation3]  }
  0x11   :  { %122 = dma.done.wait [#allocation3], 256  }
  0x12   :  { %123 = vsyncadd [#allocation3], 4294967040  ;;  %v34_v0 = vlaneseq  ;;  %v26_v2 = vld [vmem:[%s171_s0] sm:$0x3]  ;;  %v127_v3 = vmov 0   ;;  %s128_s1 = smov [#allocation5]  }
  0x13   :  { %vm27_vm0 = vnez %v26_v2  ;;  %s66_s23 = sshll.u32 %s128_s1, 4  ;;  %v28_v13 = vld [vmem:[#allocation2] sm:$0xff]  ;;  %v29_v15 = vld [vmem:[#allocation2 + $0x8] sm:$0xff]  ;;  %s67_s23 = int_to_ptr.vmem [resolvable:$true] %s66_s23 }
  0x14   :  { %v35_v1 = vshrl.u32 %v34_v0, 7  ;;  %v30_v4 = vsel %vm27_vm0, 16843009, %v127_v3  ;;  %s100_s0 = scalar_lea.vmem %s67_s23, 256  ;;  %p105_p9 = scmp.lt.s32.totalorder %s67_s23, %s67_s23 }
  0x15   :  { %v31_v5 = vunpack.c.0.s8 %v30_v4  ;;  %p101_p8 = scmp.ne.s32.totalorder %s67_s23, %s100_s0  ;;  %p106_p10 = scmp.lt.s32.totalorder %s100_s0, %s100_s0 }
  0x16   :  { %v36_v6 = vsub.s32 0, %v35_v1  ;;  %v40_v7 = vsub.s32 4, %v35_v1 }
  0x17   :  { %vm32_vm1 = vcmp.ne.s32.totalorder %v31_v5, 0  ;;  %p107_p11 = por %p106_p10, %p105_p9 }
  0x18   :  { %v33_v8 = vsel %vm32_vm1, 1, %v127_v3 }
  0x19   :  { %v37_v9 = vrot.slane %v33_v8, %v36_v6  ;;  %v41_v10 = vrot.slane %v33_v8, %v40_v7  ;;  %p108_p12 = pnand %p107_p11, %p101_p8 }
  0x1b   :  { %vm42_vm2 = vcmp.ne.s32.totalorder %v37_v9, 0  ;;  %vm43_vm3 = vcmp.ne.s32.totalorder %v41_v10, 0 }
  0x1c   :  { %v44_v11 = vsel %vm42_vm2, 1, %v127_v3  ;;  %v45_v12 = vsel %vm43_vm3, 1, %v127_v3 }
  0x1d   :  { %v49_v14 = vrot.slane %v44_v11, %v36_v6  ;;  %v53_v16 = vrot.slane %v45_v12, %v36_v6 }
  0x1f   :  { %vm54_vm4 = vcmp.eq.s32.totalorder %v49_v14, 1  ;;  %vm55_vm5 = vcmp.eq.s32.totalorder %v53_v16, 1 }
  0x20   :  { %v56_v17 = vsel %vm54_vm4, %v28_v13, 0.0  ;;  %v57_v18 = vsel %vm55_vm5, %v29_v15, 0.0 }
  0x21   :  { %58 = vst [vmem:[#allocation5] sm:$0xff] %v56_v17  ;;  %59 = vst [vmem:[#allocation5 + $0x8] sm:$0xff] %v57_v18 }
  0x22   :  { %111 = shalt.err (!%p108_p12)
}
  0x23   :  { %s112_s26 = scalar_lea.hbm %s173_s2, 256 }
  0x24   :  { %p113_p13 = scmp.ne.s32.totalorder %s173_s2, %s112_s26  ;;  %p116_p0 = scmp.lt.u32.totalorder %s112_s26, %s173_s2 }
  0x26   :  { %p118_p1 = pnand %p116_p0, %p113_p13 }
  0x28   :  { %121 = shalt.err (!%p118_p1)
}
  0x29   :  { %69 = dma.vmem_to_hbm [thread:$0]  %s67_s23, 256, %s173_s2, [#allocation4]  }
  0x2a   :  { %124 = dma.done.wait [#allocation4], 256  }
  0x2b   :  { %125 = vsyncadd [#allocation4], 4294967040 }
  0x2c   :  { %73 = vsyncpa [#allocation3], 1 }
  0x2d   :  { %74 = vsyncpa [#allocation4], 1 }

</bundles_post_ra>
